<compile_context>
chip_gen: v7x
topology: tpu7x:2x2x1
jax: 0.10.0
libtpu: 0.0.40
codegen_flags: <defaults>
</compile_context>

<pallas_src>
from functools import partial
from typing import List

import jax
import jax.numpy as jnp
from jax.experimental import pallas as pl
from jax.experimental.pallas import tpu as pltpu


def _align8(n: int) -> int:
    return ((n + 7) // 8) * 8


# --------------------------------------------------------------------------
# Kernel
# --------------------------------------------------------------------------
def _policy_kernel(layer_meta, head_meta, x_ref, p_ref, out_ref):
    """x_ref: (Bb, D); p_ref: packed params (R, C); out_ref: (Bb, 2).

    layer_meta: tuple of (row_w, row_b, m1, m2) per hidden layer (static).
    head_meta:  (row_head, H, 2) for the fused [w_mean | w_var] head (static).
    """
    h = x_ref[...].astype(jnp.float32)

    for (r_w, r_b, m1, m2) in layer_meta:
        b = p_ref[r_b:r_b + 1, 0:m2]                      # (1, m2)
        if m1 <= 8:
            # Tiny contraction dim: do it on the VPU (outer-product sum),
            # avoiding an MXU push/pop with K=m1 << 128.
            z = h[:, 0:1] * p_ref[r_w:r_w + 1, 0:m2]
            for k in range(1, m1):
                z = z + h[:, k:k + 1] * p_ref[r_w + k:r_w + k + 1, 0:m2]
        else:
            w = p_ref[r_w:r_w + m1, 0:m2]                 # (m1, m2)
            z = jnp.dot(h, w, preferred_element_type=jnp.float32)
        h = jnp.tanh(z + b)

    r_h, H, nh = head_meta
    w_head = p_ref[r_h:r_h + H, 0:nh]                     # (H, 2)
    s = jnp.dot(h, w_head, preferred_element_type=jnp.float32)  # (Bb, 2)

    # column 0 -> mu (identity); column 1 -> softplus (PyTorch threshold=20)
    sp = jnp.where(s > 20.0, s, jnp.log1p(jnp.exp(jnp.minimum(s, 20.0))))
    col = jax.lax.broadcasted_iota(jnp.int32, s.shape, 1)
    out_ref[...] = jnp.where(col == 0, s, sp)


# --------------------------------------------------------------------------
# Parameter construction / packing
# --------------------------------------------------------------------------
def init_policy_params(key, D: int, layers: List[int]):
    """Deterministic parameter init (weights (in, out), biases (1, out))."""
    params = []
    m1 = D
    for m2 in layers:
        key, kw, kb = jax.random.split(key, 3)
        scale = 1.0 / jnp.sqrt(jnp.float32(m1))
        w = jax.random.uniform(kw, (m1, m2), jnp.float32, -scale, scale)
        b = jax.random.uniform(kb, (1, m2), jnp.float32, -scale, scale)
        params.append((w, b))
        m1 = m2
    key, km, kv = jax.random.split(key, 3)
    scale = 1.0 / jnp.sqrt(jnp.float32(m1))
    w_mean = jax.random.uniform(km, (m1, 1), jnp.float32, -scale, scale)
    w_var = jax.random.uniform(kv, (m1, 1), jnp.float32, -scale, scale)
    return params, w_mean, w_var


def pack_policy_params(params, w_mean, w_var):
    """Pack all weights/biases + fused head into one (R, C) f32 buffer.

    Each segment starts on an 8-row (sublane) boundary so in-kernel static
    slices are aligned. Returns (packed, layer_meta, head_meta).
    """
    w_head = jnp.concatenate([w_mean, w_var], axis=1)     # (H, 2): [mean | var]
    C = max([w.shape[1] for (w, _) in params] + [w_head.shape[1]])

    layer_meta = []
    pieces = []
    rows = 0
    for (w, b) in params:
        m1, m2 = w.shape
        r_w = rows
        r_b = r_w + _align8(m1)
        rows = r_b + 8
        layer_meta.append((r_w, r_b, m1, m2))
        pieces.append((r_w, w))
        pieces.append((r_b, b.reshape(1, m2)))

    H, nh = w_head.shape
    r_h = rows
    rows = r_h + _align8(H)
    head_meta = (r_h, H, nh)
    pieces.append((r_h, w_head))

    total_rows = _align8(rows)
    buf = jnp.zeros((total_rows, C), jnp.float32)
    for (r, a) in pieces:
        buf = buf.at[r:r + a.shape[0], 0:a.shape[1]].set(a.astype(jnp.float32))
    return buf, tuple(layer_meta), head_meta


# --------------------------------------------------------------------------
# Forward
# --------------------------------------------------------------------------
def policy_forward(x, packed, layer_meta, head_meta, *, batch_block=512):
    """Full NeuralModel forward as a single Pallas kernel. Returns (mu, std)."""
    B, D = x.shape
    kernel = partial(_policy_kernel, layer_meta, head_meta)
    out_shape = jax.ShapeDtypeStruct((B, 2), jnp.float32)

    if B > batch_block and B % batch_block == 0:
        # Large batch: tile the batch with a parallel grid axis (v7x: 2 TCs).
        # Weights use a constant block index so they stay VMEM-resident.
        out = pl.pallas_call(
            kernel,
            grid=(B // batch_block,),
            in_specs=[
                pl.BlockSpec((batch_block, D), lambda i: (i, 0)),
                pl.BlockSpec(packed.shape, lambda i: (0, 0)),
            ],
            out_specs=pl.BlockSpec((batch_block, 2), lambda i: (i, 0)),
            out_shape=out_shape,
            compiler_params=pltpu.CompilerParams(
                dimension_semantics=("parallel",)),
        )(x, packed)
    else:
        # Small batch: gridless call, whole arrays as single VMEM blocks
        # (no pipeline scaffolding, no double buffering).
        out = pl.pallas_call(
            kernel,
            in_specs=[
                pl.BlockSpec(memory_space=pltpu.MemorySpace.VMEM),
                pl.BlockSpec(memory_space=pltpu.MemorySpace.VMEM),
            ],
            out_specs=pl.BlockSpec(memory_space=pltpu.MemorySpace.VMEM),
            out_shape=out_shape,
        )(x, packed)

    mu = out[:, 0:1]
    std = out[:, 1:2]
    return mu, std


# --------------------------------------------------------------------------
# Pure-JAX reference
# --------------------------------------------------------------------------
def _reference_forward(x, params, w_mean, w_var):
    h = x
    for w, b in params:
        h = jnp.tanh(h @ w + b)
    mu = h @ w_mean
    std = jax.nn.softplus(h @ w_var)
    return mu, std


if __name__ == "__main__":
    # Mountain-car-like setup: state dim D=2, two hidden layers of 32 units.
    D = 2
    layers = [32, 32]
    B = 8

    key = jax.random.PRNGKey(0)
    key, kx = jax.random.split(key)
    x = jax.random.normal(kx, (B, D), jnp.float32)

    params, w_mean, w_var = init_policy_params(key, D, layers)
    packed, layer_meta, head_meta = pack_policy_params(params, w_mean, w_var)

    mu, std = policy_forward(x, packed, layer_meta, head_meta)
    mu, std = jax.block_until_ready((mu, std))

    # sanity check against pure-JAX reference
    mu_ref, std_ref = _reference_forward(x, params, w_mean, w_var)
    assert mu.shape == (B, 1) and std.shape == (B, 1)
    assert jnp.allclose(mu, mu_ref, atol=1e-5, rtol=1e-5)
    assert jnp.allclose(std, std_ref, atol=1e-5, rtol=1e-5)
    assert bool(jnp.all(std > 0.0))

    print("KERNEL_OK")
</pallas_src>

<mosaic_0001>
module attributes {stable_mosaic.version = 11 : i64} {
  func.func @_policy_kernel(%arg0: memref<8x2xf32, #tpu.memory_space<vmem>>, %arg1: memref<88x32xf32, #tpu.memory_space<vmem>>, %arg2: memref<8x2xf32, #tpu.memory_space<vmem>>) attributes {dimension_semantics = [], scalar_prefetch = 0 : i64, scratch_operands = 0 : i64, tpu.core_type = #tpu.core_type<tc>} {
    %c0 = arith.constant 0 : index
    %c0_0 = arith.constant 0 : index
    %0 = vector.load %arg0[%c0, %c0_0] : memref<8x2xf32, #tpu.memory_space<vmem>>, vector<8x2xf32>
    %c8 = arith.constant 8 : index
    %c0_1 = arith.constant 0 : index
    %1 = vector.load %arg1[%c8, %c0_1] : memref<88x32xf32, #tpu.memory_space<vmem>>, vector<1x32xf32>
    %2 = vector.extract_strided_slice %0 {offsets = [0, 0], sizes = [8, 1], strides = [1, 1]} : vector<8x2xf32> to vector<8x1xf32>
    %c0_2 = arith.constant 0 : index
    %c0_3 = arith.constant 0 : index
    %3 = vector.load %arg1[%c0_2, %c0_3] : memref<88x32xf32, #tpu.memory_space<vmem>>, vector<1x32xf32>
    %4 = vector.broadcast %2 : vector<8x1xf32> to vector<8x32xf32>
    %5 = vector.broadcast %3 : vector<1x32xf32> to vector<8x32xf32>
    %6 = arith.mulf %4, %5 : vector<8x32xf32>
    %7 = vector.extract_strided_slice %0 {offsets = [0, 1], sizes = [8, 1], strides = [1, 1]} : vector<8x2xf32> to vector<8x1xf32>
    %c1 = arith.constant 1 : index
    %c0_4 = arith.constant 0 : index
    %8 = vector.load %arg1[%c1, %c0_4] : memref<88x32xf32, #tpu.memory_space<vmem>>, vector<1x32xf32>
    %9 = vector.broadcast %7 : vector<8x1xf32> to vector<8x32xf32>
    %10 = vector.broadcast %8 : vector<1x32xf32> to vector<8x32xf32>
    %11 = arith.mulf %9, %10 : vector<8x32xf32>
    %12 = arith.addf %6, %11 : vector<8x32xf32>
    %13 = vector.broadcast %1 : vector<1x32xf32> to vector<8x32xf32>
    %14 = arith.addf %12, %13 : vector<8x32xf32>
    %15 = math.tanh %14 : vector<8x32xf32>
    %c48 = arith.constant 48 : index
    %c0_5 = arith.constant 0 : index
    %16 = vector.load %arg1[%c48, %c0_5] : memref<88x32xf32, #tpu.memory_space<vmem>>, vector<1x32xf32>
    %c16 = arith.constant 16 : index
    %c0_6 = arith.constant 0 : index
    %17 = vector.load %arg1[%c16, %c0_6] : memref<88x32xf32, #tpu.memory_space<vmem>>, vector<32x32xf32>
    %cst = arith.constant dense<0.000000e+00> : vector<8x32xf32>
    %18 = tpu.matmul %15, %17, %cst {dimension_numbers = #tpu.dot_dimension_numbers<[1], [0], [0], [1], [0, 0, 1, 1], [], []>} : vector<8x32xf32>, vector<32x32xf32>, vector<8x32xf32> -> vector<8x32xf32>
    %19 = vector.broadcast %16 : vector<1x32xf32> to vector<8x32xf32>
    %20 = arith.addf %18, %19 : vector<8x32xf32>
    %21 = math.tanh %20 : vector<8x32xf32>
    %c56 = arith.constant 56 : index
    %c0_7 = arith.constant 0 : index
    %22 = vector.load %arg1[%c56, %c0_7] : memref<88x32xf32, #tpu.memory_space<vmem>>, vector<32x2xf32>
    %cst_8 = arith.constant dense<0.000000e+00> : vector<8x2xf32>
    %23 = tpu.matmul %21, %22, %cst_8 {dimension_numbers = #tpu.dot_dimension_numbers<[1], [0], [0], [1], [0, 0, 1, 1], [], []>} : vector<8x32xf32>, vector<32x2xf32>, vector<8x2xf32> -> vector<8x2xf32>
    %cst_9 = arith.constant 2.000000e+01 : f32
    %24 = vector.broadcast %cst_9 : f32 to vector<8x2xf32>
    %25 = arith.cmpf ogt, %23, %24 : vector<8x2xf32>
    %cst_10 = arith.constant 2.000000e+01 : f32
    %26 = vector.broadcast %cst_10 : f32 to vector<8x2xf32>
    %27 = arith.minimumf %23, %26 : vector<8x2xf32>
    %28 = math.exp %27 : vector<8x2xf32>
    %29 = math.log1p %28 : vector<8x2xf32>
    %30 = arith.select %25, %23, %29 : vector<8x2xi1>, vector<8x2xf32>
    %31 = tpu.iota {dimensions = array<i32: 1>} : vector<8x2xi32>
    %c0_i32 = arith.constant 0 : i32
    %32 = vector.broadcast %c0_i32 : i32 to vector<8x2xi32>
    %33 = arith.cmpi eq, %31, %32 : vector<8x2xi32>
    %34 = arith.select %33, %23, %30 : vector<8x2xi1>, vector<8x2xf32>
    %c0_11 = arith.constant 0 : index
    %c0_12 = arith.constant 0 : index
    %35 = vector.load %arg2[%c0_11, %c0_12] : memref<8x2xf32, #tpu.memory_space<vmem>>, vector<8x2xf32>
    tpu.vector_store %arg2[%c0_11, %c0_12], %34 {strides = array<i32>} : memref<8x2xf32, #tpu.memory_space<vmem>>, vector<8x2xf32>,
    return
  }
}

</mosaic_0001>

<bundles_post_ra>
// kernel: tpu_custom_call.1
= control target key start
LH: loop header
LB: loop body
LE: loop exit
PB: predicated region body
PF: predicated region fallthrough
CT: control target
= control target key end

     0   :  { %v291_v0 = vmov 0   ;;  %v292_v2 = vmov 1   ;;  %v293_v6 = vmov 0.0|0.0   ;;  %vm294_vm0 = vmmov 0   ;;  %s355_s0 = inlined_call_operand.vmem [shape: f32[8,2], index: 0, kind: input, shape index: {}]   ;;  %s356_s1 = inlined_call_operand.vmem [shape: f32[88,32], index: 1, kind: input, shape index: {}]   ;;  %s357_s2 = inlined_call_operand.vmem [shape: f32[8,2], index: 2, kind: output, shape index: {}]  }
   0x1   :  { %281 = vset.pattern.permute.xlu0 %v291_v0  ;;  %v11_v1 = vld [vmem:[%s355_s0] sm:$0xff]  ;;  %v42_v3 = vld [vmem:[%s356_s1 + $0x10] sm:$0xff]  ;;  %v43_v4 = vld [vmem:[%s356_s1 + $0x18] sm:$0xff]  ;;  %264 = vmatprep.subr.bf16.mxu0 %v293_v6  ;;  %v295_v9 = vmov 0.0   ;;  %vm50_vm1 = vcmask 261120   ;;  %v216_v39 = vlaneseq  ;;  %vm220_vm5 = vcmask 15360  }
   0x2   :  { %16 = vperm.xlu0 %281, %v11_v1   ;;  %v44_v5 = vld [vmem:[%s356_s1 + $0x20] sm:$0xff]  ;;  %v265_v7 = vpack.c.bf16 %v43_v4, %v42_v3  ;;  %v45_v8 = vld [vmem:[%s356_s1 + $0x28] sm:$0xff]  ;;  %250 = vmatprep.mubr.msk.f32.mxu0 %vm294_vm0, %v295_v9  ;;  %v125_v21 = vld [vmem:[%s356_s1 + $0x38] sm:$0xff] }
   0x3   :  { %270 = vmatprep.subr.bf16.mxu1 %v293_v6  ;;  %261 = vmatprep.mubr.msk.f32.mxu1 %vm294_vm0, %v295_v9  ;;  %v268_v10 = vpack.c.bf16 %v45_v8, %v44_v5  ;;  %v226_v12 = vld [vmem:[%s356_s1] ss:$0 sm:$0xff]  ;;  %v227_v13 = vld [vmem:[%s356_s1 + $0x1] ss:$0 sm:$0xff]  ;;  %v228_v17 = vld [vmem:[%s356_s1 + $0x8] ss:$0 sm:$0xff] }
   0x4   :  { %266 = vmatpush3.bf16.msra.mxu0 %v265_v7  ;;  %v126_v22 = vld [vmem:[%s356_s1 + $0x40] sm:$0xff]  ;;  %v127_v23 = vld [vmem:[%s356_s1 + $0x48] sm:$0xff]  ;;  %v128_v25 = vld [vmem:[%s356_s1 + $0x50] sm:$0xff]  ;;  %v217_v42 = vand.u32 127, %v216_v39 }
   0x5   :  { %267 = vmatprep.subr.bf16.mxu0 %v293_v6  ;;  %v271_v24 = vpack.c.bf16 %v126_v22, %v125_v21  ;;  %v274_v26 = vpack.c.bf16 %v128_v25, %v127_v23  ;;  %v229_v27 = vld [vmem:[%s356_s1 + $0x30] ss:$0 sm:$0xff] }
   0x6   :  { %282 = vset.pattern.permute.xlu0 %v292_v2  ;;  %vm218_vm3 = vcmp.eq.s32.totalorder %v217_v42, 0 }
   0x7   :  { %26 = vperm.xlu0 %282, %v11_v1   ;;  %272 = vmatpush3.bf16.msra.mxu1 %v271_v24 }
   0x8   :  { %269 = vmatpush3.bf16.msra.mxu0 %v268_v10  ;;  %273 = vmatprep.subr.bf16.mxu1 %v293_v6 }
   0xb   :  { %275 = vmatpush3.bf16.msra.mxu1 %v274_v26 }
  0x81   :  { %v17_v11 = vpop.permute.xlu0 %16 }
  0x82   :  { %v23_v15 = vmul.f32 %v226_v12, %v17_v11 }
  0x86   :  { %v27_v14 = vpop.permute.xlu0 %26 }
  0x87   :  { %v33_v16 = vmul.f32 %v227_v13, %v27_v14 }
  0x89   :  { %v34_v18 = vadd.f32 %v33_v16, %v23_v15 }
  0x8b   :  { %v39_v19 = vadd.f32 %v228_v17, %v34_v18 }
  0x8d   :  { %283 = vtanh.f32 %v39_v19 }
  0x97   :  { %v284_v20 = vpop.eup %283 }
  0x98   :  { %251 = vmatmul.mubr.msk.f32.vlgmr.msra.gmra.mrb[0].mxu0 %vm50_vm1, %v284_v20 }
 0x16b   :  { %v120_v28 = vpop.f32.mrb[0].mxu0 }
 0x16c   :  { %v121_v29 = vadd.f32 %v229_v27, %v120_v28  ;;  %v252_v30 = vpop.f32.mrb[1].mxu0 }
 0x16e   :  { %285 = vtanh.f32 %v121_v29 }
 0x178   :  { %v286_v31 = vpop.eup %285 }
 0x179   :  { %262 = vmatmul.mubr.msk.f32.vlgmr.msra.gmra.mrb[0].mxu1 %vm50_vm1, %v286_v31 }
 0x24c   :  { %v198_v32 = vpop.f32.mrb[0].mxu1 }
 0x24d   :  { %v203_v33 = vmin.f32 %v198_v32, 20.0  ;;  %v263_v34 = vpop.f32.mrb[1].mxu1  ;;  %vm202_vm4 = vcmp.gt.f32.partialorder %v198_v32, 20.0 }
 0x24f   :  { %v204_v35 = vmul.f32 1.442695, %v203_v33 }
 0x251   :  { %287 = vpow2.f32 %v204_v35 }
 0x25b   :  { %v288_v36 = vpop.eup %287 }
 0x25c   :  { %v206_v37 = vadd.f32 1.0, %v288_v36  ;;  %v209_v38 = vmul.f32 -0.5, %v288_v36  ;;  %v212_v41 = vand.u32 2147483647, %v288_v36 }
 0x25e   :  { %289 = vlog2.f32 %v206_v37  ;;  %v210_v40 = vadd.f32 1.0, %v209_v38  ;;  %vm213_vm2 = vcmp.lt.f32.partialorder %v212_v41, 0.0004427343 }
 0x260   :  { %v211_v45 = vmul.f32 %v288_v36, %v210_v40 }
 0x268   :  { %v290_v43 = vpop.eup %289 }
 0x269   :  { %v208_v44 = vmul.f32 0.6931472, %v290_v43 }
 0x26b   :  { %v214_v46 = vsel %vm213_vm2, %v211_v45, %v208_v44 }
 0x26c   :  { %v215_v47 = vsel %vm202_vm4, %v198_v32, %v214_v46 }
 0x26d   :  { %v219_v48 = vsel %vm218_vm3, %v198_v32, %v215_v47 }
 0x26e   :  { %221 = vst.msk [vmem:[%s357_s2] sm:$0xff] %vm220_vm5, %v219_v48 }

</bundles_post_ra>
